<compile_context>
chip_gen: v7x
topology: tpu7x:2x2x1
jax: 0.10.0
libtpu: 0.0.40
codegen_flags: <defaults>
</compile_context>

<pallas_src>
import functools

import jax
import jax.numpy as jnp
from jax.experimental import pallas as pl
from jax.experimental.pallas import tpu as pltpu


def _round_up(x, m):
    return (x + m - 1) // m * m


# ----------------------------- Pallas kernel --------------------------------

def make_fused_kernel(*, seq_len, vocab, sv_pad, nd_cols, mlp_blocks):
    """Fused encoder + MLP forward.

    refs = (cate_i32, numedemo, enc_pack, mlp_pack, out)
      cate_i32 : (Bt, S) int32 raw categories
      numedemo : (Bt, nd_cols) f32  = [nume flattened i*S+s | demo | zero pad]
      enc_pack : (sv_pad + nd_cols, H) f32  = [embedding fold ; conv/demo fold]
      mlp_pack : packed (W^T, bias-row) blocks, sliced statically per layer
    """
    S = int(seq_len)
    inv_s = 1.0 / S                      # float math for //S and %S (always lowers)
    f32 = jnp.float32
    n_blk = len(mlp_blocks)

    def kernel(cate_ref, nd_ref, enc_ref, mlp_ref, o_ref):
        Bt = cate_ref.shape[0]

        # ---- build the (Bt, sv_pad) one-hot in-kernel (cate stays int32) -------
        # T_rep[s, k] = 1 iff (k mod S) == s, so  cate_f @ T_rep  repeats each
        # category value `vocab` times in the v-major lane layout k = v*S + s.
        row_s = jax.lax.broadcasted_iota(jnp.int32, (S, sv_pad), 0).astype(f32)
        k_f = jax.lax.broadcasted_iota(jnp.int32, (S, sv_pad), 1).astype(f32)
        s_of_k = k_f - jnp.floor(k_f * inv_s) * S
        t_rep = (jnp.abs(s_of_k - row_s) < 0.5).astype(f32)

        cate_f = cate_ref[...].astype(f32)                              # (Bt, S)
        cate_rep = jnp.dot(cate_f, t_rep, preferred_element_type=f32)   # (Bt, sv_pad)

        kb_f = jax.lax.broadcasted_iota(jnp.int32, (Bt, sv_pad), 1).astype(f32)
        v_of_k = jnp.floor(kb_f * inv_s)
        # onehot[b, v*S+s] = (cate[b,s] == v).  Padded lanes (v >= vocab) and
        # out-of-range categories give 0 (same as jax.nn.one_hot behaviour).
        onehot = (jnp.abs(cate_rep - v_of_k) < 0.5).astype(f32)

        # ---- encoder: two MXU passes over one packed weight buffer -------------
        x = jnp.dot(onehot, enc_ref[0:sv_pad, :], preferred_element_type=f32)
        x = x + jnp.dot(nd_ref[...], enc_ref[sv_pad:sv_pad + nd_cols, :],
                        preferred_element_type=f32)

        # ---- MLP: Linear(+ReLU) blocks from one packed W/b buffer --------------
        # (use_bn=False, ps=0, fc_dropout=0 -> LinBnDrop == Linear + ReLU; head is
        #  a plain Linear, bn_final=False, y_range=None.)
        for li, (r0, n_in, n_out) in enumerate(mlp_blocks):
            w = mlp_ref[r0:r0 + n_in, 0:n_out]
            b = mlp_ref[r0 + n_in:r0 + n_in + 1, 0:n_out]
            x = jnp.dot(x, w, preferred_element_type=f32) + b
            if li < n_blk - 1:
                x = jnp.maximum(x, 0.0)

        o_ref[...] = x

    return kernel


# ------------------------------ wrappers -------------------------------------

def fused_forward(cate, numedemo, enc_pack, mlp_pack, *, meta):
    S, V, sv_pad, nd_cols, mlp_blocks, c_out, batch_block = meta
    B = cate.shape[0]
    H = enc_pack.shape[1]

    kernel = make_fused_kernel(seq_len=S, vocab=V, sv_pad=sv_pad,
                               nd_cols=nd_cols, mlp_blocks=mlp_blocks)
    out_shape = jax.ShapeDtypeStruct((B, c_out), jnp.float32)

    # Advisory cost estimate: tells XLA this custom call is tiny / overlappable.
    flops = 2 * B * (S * sv_pad + sv_pad * H + nd_cols * H
                     + sum(n_in * n_out for _, n_in, n_out in mlp_blocks))
    bytes_accessed = 4 * (cate.size + numedemo.size + enc_pack.size
                          + mlp_pack.size + B * c_out)
    cost = pl.CostEstimate(flops=int(flops), transcendentals=0,
                           bytes_accessed=int(bytes_accessed))

    vmem = pl.BlockSpec(memory_space=pltpu.MemorySpace.VMEM)

    if B <= batch_block or B % batch_block != 0:
        # Launch/DMA-descriptor-bound regime (tiny batch): one gridless call,
        # everything as full-array VMEM blocks.  (Callers should pad B to a
        # multiple of 8 -- and of batch_block for the scaling path -- when free.)
        return pl.pallas_call(
            kernel,
            out_shape=out_shape,
            in_specs=[vmem, vmem, vmem, vmem],
            out_specs=vmem,
            cost_estimate=cost,
        )(cate, numedemo, enc_pack, mlp_pack)

    # Batch-scaling path: 1-D "parallel" grid over batch tiles (megacore / v7x
    # dual-TC friendly); weight specs return block (0, 0) every step so the
    # packed weights stay resident in VMEM.
    grid_spec = pltpu.PrefetchScalarGridSpec(
        num_scalar_prefetch=0,
        grid=(B // batch_block,),
        in_specs=[
            pl.BlockSpec((batch_block, cate.shape[1]), lambda i: (i, 0)),
            pl.BlockSpec((batch_block, numedemo.shape[1]), lambda i: (i, 0)),
            pl.BlockSpec(enc_pack.shape, lambda i: (0, 0)),
            pl.BlockSpec(mlp_pack.shape, lambda i: (0, 0)),
        ],
        out_specs=pl.BlockSpec((batch_block, c_out), lambda i: (i, 0)),
    )
    return pl.pallas_call(
        kernel,
        out_shape=out_shape,
        grid_spec=grid_spec,
        compiler_params=pltpu.CompilerParams(dimension_semantics=("parallel",)),
        cost_estimate=cost,
    )(cate, numedemo, enc_pack, mlp_pack)


@functools.partial(jax.jit, static_argnames=("meta",))
def _forward_jit(enc_pack, mlp_pack, cate, nume, demo, *, meta):
    nd_cols = meta[3]
    B = cate.shape[0]
    nume_flat = nume.reshape(B, -1).astype(jnp.float32)          # (B, 10*S), i*S+s
    parts = [nume_flat, demo.astype(jnp.float32)]
    pad = nd_cols - (nume_flat.shape[1] + demo.shape[1])
    if pad:
        parts.append(jnp.zeros((B, pad), jnp.float32))
    numedemo = jnp.concatenate(parts, axis=1)                    # (B, nd_cols)
    return fused_forward(cate.astype(jnp.int32), numedemo, enc_pack, mlp_pack,
                         meta=meta)


def mlp_model_forward(fp, cate, nume, demo):
    return _forward_jit(fp["enc_pack"], fp["mlp_pack"], cate, nume, demo,
                        meta=fp["meta"])


# -------------------------- parameter preparation ----------------------------

def prepare_fused_params(params, *, seq_len, vocab, batch_block=256):
    """Fold the (linear) encoder weights into the flattened 128-lane layout and
    pack everything into two VMEM buffers (encoder pack + MLP pack).  The folds
    only insert exact zeros / reorder MXU accumulation (numerically faithful)."""
    emb_table = params["cate_emb_table"]            # (vocab, c_emb)
    w_nume = params["w_nume"]                       # (c_emb, 10)  Conv1d k=1 weight
    w_demo = params["w_demo"]                       # (c_emb, 4)   nn.Linear weight
    c_emb = emb_table.shape[1]
    S, V = int(seq_len), int(vocab)
    H = c_emb * S
    eye = jnp.eye(S, dtype=jnp.float32)

    # Embedding fold, v-major rows to match the in-kernel one-hot layout:
    #   E[v*S+s, c*S+t] = emb_table[v, c] * (s == t)
    e_fold = jnp.einsum("vc,st->vsct", emb_table, eye).reshape(V * S, H)
    sv_pad = _round_up(V * S, 8)
    e_fold = jnp.concatenate(
        [e_fold, jnp.zeros((sv_pad - V * S, H), jnp.float32)], axis=0)

    # Conv1d(10->c_emb, k=1) fold:  A[i*S+s, c*S+t] = w_nume[c, i] * (s == t)
    a_nume = jnp.einsum("ci,st->isct", w_nume, eye).reshape(w_nume.shape[1] * S, H)
    # Linear(4->c_emb, no bias) fold, broadcast over seq:  D[j, c*S+s] = w_demo[c, j]
    n_demo = w_demo.shape[1]
    wd_flat = jnp.broadcast_to(w_demo.T[:, :, None], (n_demo, c_emb, S)).reshape(n_demo, H)

    nd_raw = a_nume.shape[0] + n_demo
    nd_cols = _round_up(nd_raw, 8)                  # pad K to x8: no masked sublane loads
    ad_fold = jnp.concatenate(
        [a_nume, wd_flat, jnp.zeros((nd_cols - nd_raw, H), jnp.float32)], axis=0)

    enc_pack = jnp.concatenate([e_fold, ad_fold], axis=0)        # (sv_pad+nd_cols, H)

    # --- single packed MLP weight/bias buffer, sliced statically in-kernel ---
    wbs = list(params["mlp_layers"]) + [params["head"]]
    width = max(int(w.shape[0]) for w, _ in wbs)
    blocks, chunks, r = [], [], 0
    for w, b in wbs:                                             # torch layout (out, in)
        n_out, n_in = int(w.shape[0]), int(w.shape[1])
        blk_rows = _round_up(n_in + 1, 8)
        blk = jnp.zeros((blk_rows, width), jnp.float32)
        blk = blk.at[:n_in, :n_out].set(w.T)
        blk = blk.at[n_in, :n_out].set(b)                        # bias row after W
        chunks.append(blk)
        blocks.append((r, n_in, n_out))
        r += blk_rows
    mlp_pack = jnp.concatenate(chunks, axis=0)                   # (216, 32) here

    c_out = int(wbs[-1][0].shape[0])
    meta = (S, V, int(sv_pad), int(nd_cols), tuple(blocks), c_out, int(batch_block))
    return dict(enc_pack=enc_pack, mlp_pack=mlp_pack, meta=meta)


# --------------------------- reference (plain JAX) ---------------------------

def reference_forward(params, cate, nume, demo):
    """Un-folded math, mirrors the PyTorch module op-for-op."""
    emb = params["cate_emb_table"][cate]                      # (B, S, c_emb)
    x_cate = jnp.transpose(emb, (0, 2, 1))                    # (B, c_emb, S)
    x_nume = jnp.einsum("oi,bis->bos", params["w_nume"], nume)
    x_demo = (demo @ params["w_demo"].T)[:, :, None]
    h = x_cate + x_nume + x_demo
    x = h.reshape(h.shape[0], -1)                             # Reshape(-1)
    for w, b in params["mlp_layers"]:
        x = jnp.maximum(x @ w.T + b, 0.0)
    w_h, b_h = params["head"]
    return x @ w_h.T + b_h


# ------------------------------- setup ---------------------------------------

def init_params(key, *, c_emb, c_out, seq_len, layers, vocab):
    ks = jax.random.split(key, 8)
    params = {}
    # TODO(synk): CateEncoder source was not provided; modeled as a single
    # nn.Embedding(vocab, c_emb) lookup emitted channel-first (B, c_emb, S).
    params["cate_emb_table"] = 0.1 * jax.random.normal(ks[0], (vocab, c_emb), jnp.float32)
    # Conv1d kaiming_normal_(fan_out, relu): std = sqrt(2 / (c_emb * 1))
    params["w_nume"] = jax.random.normal(ks[1], (c_emb, 10), jnp.float32) * jnp.sqrt(2.0 / c_emb)
    params["w_demo"] = 0.3 * jax.random.normal(ks[2], (c_emb, 4), jnp.float32)

    nf = [c_emb * seq_len] + list(layers)
    mlp_layers = []
    kidx = 3
    for i in range(len(layers)):
        w = jax.random.normal(ks[kidx], (nf[i + 1], nf[i]), jnp.float32) / jnp.sqrt(nf[i])
        b = 0.01 * jnp.arange(nf[i + 1], dtype=jnp.float32)
        mlp_layers.append((w, b))
        kidx += 1
    params["mlp_layers"] = mlp_layers

    w_h = jax.random.normal(ks[kidx], (c_out, nf[-1]), jnp.float32) / jnp.sqrt(nf[-1])
    b_h = 0.01 * jnp.arange(c_out, dtype=jnp.float32)
    params["head"] = (w_h, b_h)
    return params


if __name__ == "__main__":
    B, c_emb, c_out, seq_len = 2, 8, 4, 16
    layers = [32, 32]
    vocab = 11

    key = jax.random.PRNGKey(0)
    k_p, k_cate, k_nume, k_demo, k_big = jax.random.split(key, 5)

    params = init_params(k_p, c_emb=c_emb, c_out=c_out, seq_len=seq_len,
                         layers=layers, vocab=vocab)
    fp = prepare_fused_params(params, seq_len=seq_len, vocab=vocab, batch_block=256)

    cate = jax.random.randint(k_cate, (B, seq_len), 0, vocab, dtype=jnp.int32)
    nume = jax.random.normal(k_nume, (B, 10, seq_len), jnp.float32)
    demo = jax.random.normal(k_demo, (B, 4), jnp.float32)

    # Small batch: gridless fused kernel.
    out = jax.block_until_ready(mlp_model_forward(fp, cate, nume, demo))
    ref = jax.block_until_ready(reference_forward(params, cate, nume, demo))
    assert out.shape == (B, c_out), out.shape
    assert jnp.allclose(out, ref, atol=1e-4, rtol=1e-4), (out, ref)

    # Large batch: exercises the batch-parallel grid path (resident weights,
    # "parallel" batch axis for megacore / v7x dual TensorCore).
    B2 = 512
    kc, kn, kd = jax.random.split(k_big, 3)
    cate2 = jax.random.randint(kc, (B2, seq_len), 0, vocab, dtype=jnp.int32)
    nume2 = jax.random.normal(kn, (B2, 10, seq_len), jnp.float32)
    demo2 = jax.random.normal(kd, (B2, 4), jnp.float32)

    out2 = jax.block_until_ready(mlp_model_forward(fp, cate2, nume2, demo2))
    ref2 = jax.block_until_ready(reference_forward(params, cate2, nume2, demo2))
    assert out2.shape == (B2, c_out), out2.shape
    assert jnp.allclose(out2, ref2, atol=5e-4, rtol=5e-4), \
        float(jnp.max(jnp.abs(out2 - ref2)))

    print("KERNEL_OK")
</pallas_src>

<mosaic_0001>
module attributes {stable_mosaic.version = 11 : i64} {
  func.func @kernel(%arg0: memref<2x16xi32, #tpu.memory_space<vmem>>, %arg1: memref<2x168xf32, #tpu.memory_space<vmem>>, %arg2: memref<344x128xf32, #tpu.memory_space<vmem>>, %arg3: memref<216x32xf32, #tpu.memory_space<vmem>>, %arg4: memref<2x4xf32, #tpu.memory_space<vmem>>) attributes {dimension_semantics = [], scalar_prefetch = 0 : i64, scratch_operands = 0 : i64, tpu.core_type = #tpu.core_type<tc>} {
    %0 = tpu.iota {dimensions = array<i32: 0>} : vector<16x176xi32>
    %1 = arith.sitofp %0 : vector<16x176xi32> to vector<16x176xf32>
    %2 = tpu.iota {dimensions = array<i32: 1>} : vector<16x176xi32>
    %3 = arith.sitofp %2 : vector<16x176xi32> to vector<16x176xf32>
    %cst = arith.constant 6.250000e-02 : f32
    %4 = vector.broadcast %cst : f32 to vector<16x176xf32>
    %5 = arith.mulf %3, %4 : vector<16x176xf32>
    %6 = math.floor %5 : vector<16x176xf32>
    %cst_0 = arith.constant 1.600000e+01 : f32
    %7 = vector.broadcast %cst_0 : f32 to vector<16x176xf32>
    %8 = arith.mulf %6, %7 : vector<16x176xf32>
    %9 = arith.subf %3, %8 : vector<16x176xf32>
    %10 = arith.subf %9, %1 : vector<16x176xf32>
    %11 = math.absf %10 : vector<16x176xf32>
    %cst_1 = arith.constant 5.000000e-01 : f32
    %12 = vector.broadcast %cst_1 : f32 to vector<16x176xf32>
    %13 = arith.cmpf olt, %11, %12 : vector<16x176xf32>
    %14 = arith.extui %13 : vector<16x176xi1> to vector<16x176xi32>
    %15 = arith.sitofp %14 : vector<16x176xi32> to vector<16x176xf32>
    %c0 = arith.constant 0 : index
    %c0_2 = arith.constant 0 : index
    %16 = vector.load %arg0[%c0, %c0_2] : memref<2x16xi32, #tpu.memory_space<vmem>>, vector<2x16xi32>
    %17 = arith.sitofp %16 : vector<2x16xi32> to vector<2x16xf32>
    %cst_3 = arith.constant dense<0.000000e+00> : vector<2x176xf32>
    %18 = tpu.matmul %17, %15, %cst_3 {dimension_numbers = #tpu.dot_dimension_numbers<[1], [0], [0], [1], [0, 0, 1, 1], [], []>} : vector<2x16xf32>, vector<16x176xf32>, vector<2x176xf32> -> vector<2x176xf32>
    %19 = tpu.iota {dimensions = array<i32: 1>} : vector<2x176xi32>
    %20 = arith.sitofp %19 : vector<2x176xi32> to vector<2x176xf32>
    %cst_4 = arith.constant 6.250000e-02 : f32
    %21 = vector.broadcast %cst_4 : f32 to vector<2x176xf32>
    %22 = arith.mulf %20, %21 : vector<2x176xf32>
    %23 = math.floor %22 : vector<2x176xf32>
    %24 = arith.subf %18, %23 : vector<2x176xf32>
    %25 = math.absf %24 : vector<2x176xf32>
    %cst_5 = arith.constant 5.000000e-01 : f32
    %26 = vector.broadcast %cst_5 : f32 to vector<2x176xf32>
    %27 = arith.cmpf olt, %25, %26 : vector<2x176xf32>
    %28 = arith.extui %27 : vector<2x176xi1> to vector<2x176xi32>
    %29 = arith.sitofp %28 : vector<2x176xi32> to vector<2x176xf32>
    %c0_6 = arith.constant 0 : index
    %c0_7 = arith.constant 0 : index
    %30 = vector.load %arg2[%c0_6, %c0_7] : memref<344x128xf32, #tpu.memory_space<vmem>>, vector<176x128xf32>
    %cst_8 = arith.constant dense<0.000000e+00> : vector<2x128xf32>
    %31 = tpu.matmul %29, %30, %cst_8 {dimension_numbers = #tpu.dot_dimension_numbers<[1], [0], [0], [1], [0, 0, 1, 1], [], []>} : vector<2x176xf32>, vector<176x128xf32>, vector<2x128xf32> -> vector<2x128xf32>
    %c0_9 = arith.constant 0 : index
    %c0_10 = arith.constant 0 : index
    %32 = vector.load %arg1[%c0_9, %c0_10] : memref<2x168xf32, #tpu.memory_space<vmem>>, vector<2x168xf32>
    %c176 = arith.constant 176 : index
    %c0_11 = arith.constant 0 : index
    %33 = vector.load %arg2[%c176, %c0_11] : memref<344x128xf32, #tpu.memory_space<vmem>>, vector<168x128xf32>
    %cst_12 = arith.constant dense<0.000000e+00> : vector<2x128xf32>
    %34 = tpu.matmul %32, %33, %cst_12 {dimension_numbers = #tpu.dot_dimension_numbers<[1], [0], [0], [1], [0, 0, 1, 1], [], []>} : vector<2x168xf32>, vector<168x128xf32>, vector<2x128xf32> -> vector<2x128xf32>
    %35 = arith.addf %31, %34 : vector<2x128xf32>
    %c0_13 = arith.constant 0 : index
    %c0_14 = arith.constant 0 : index
    %36 = vector.load %arg3[%c0_13, %c0_14] : memref<216x32xf32, #tpu.memory_space<vmem>>, vector<128x32xf32>
    %c128 = arith.constant 128 : index
    %c0_15 = arith.constant 0 : index
    %37 = vector.load %arg3[%c128, %c0_15] : memref<216x32xf32, #tpu.memory_space<vmem>>, vector<1x32xf32>
    %cst_16 = arith.constant dense<0.000000e+00> : vector<2x32xf32>
    %38 = tpu.matmul %35, %36, %cst_16 {dimension_numbers = #tpu.dot_dimension_numbers<[1], [0], [0], [1], [0, 0, 1, 1], [], []>} : vector<2x128xf32>, vector<128x32xf32>, vector<2x32xf32> -> vector<2x32xf32>
    %39 = vector.broadcast %37 : vector<1x32xf32> to vector<2x32xf32>
    %40 = arith.addf %38, %39 : vector<2x32xf32>
    %cst_17 = arith.constant 0.000000e+00 : f32
    %41 = vector.broadcast %cst_17 : f32 to vector<2x32xf32>
    %42 = arith.maximumf %40, %41 : vector<2x32xf32>
    %c136 = arith.constant 136 : index
    %c0_18 = arith.constant 0 : index
    %43 = vector.load %arg3[%c136, %c0_18] : memref<216x32xf32, #tpu.memory_space<vmem>>, vector<32x32xf32>
    %c168 = arith.constant 168 : index
    %c0_19 = arith.constant 0 : index
    %44 = vector.load %arg3[%c168, %c0_19] : memref<216x32xf32, #tpu.memory_space<vmem>>, vector<1x32xf32>
    %cst_20 = arith.constant dense<0.000000e+00> : vector<2x32xf32>
    %45 = tpu.matmul %42, %43, %cst_20 {dimension_numbers = #tpu.dot_dimension_numbers<[1], [0], [0], [1], [0, 0, 1, 1], [], []>} : vector<2x32xf32>, vector<32x32xf32>, vector<2x32xf32> -> vector<2x32xf32>
    %46 = vector.broadcast %44 : vector<1x32xf32> to vector<2x32xf32>
    %47 = arith.addf %45, %46 : vector<2x32xf32>
    %cst_21 = arith.constant 0.000000e+00 : f32
    %48 = vector.broadcast %cst_21 : f32 to vector<2x32xf32>
    %49 = arith.maximumf %47, %48 : vector<2x32xf32>
    %c176_22 = arith.constant 176 : index
    %c0_23 = arith.constant 0 : index
    %50 = vector.load %arg3[%c176_22, %c0_23] : memref<216x32xf32, #tpu.memory_space<vmem>>, vector<32x4xf32>
    %c208 = arith.constant 208 : index
    %c0_24 = arith.constant 0 : index
    %51 = vector.load %arg3[%c208, %c0_24] : memref<216x32xf32, #tpu.memory_space<vmem>>, vector<1x4xf32>
    %cst_25 = arith.constant dense<0.000000e+00> : vector<2x4xf32>
    %52 = tpu.matmul %49, %50, %cst_25 {dimension_numbers = #tpu.dot_dimension_numbers<[1], [0], [0], [1], [0, 0, 1, 1], [], []>} : vector<2x32xf32>, vector<32x4xf32>, vector<2x4xf32> -> vector<2x4xf32>
    %53 = vector.broadcast %51 : vector<1x4xf32> to vector<2x4xf32>
    %54 = arith.addf %52, %53 : vector<2x4xf32>
    %c0_26 = arith.constant 0 : index
    %c0_27 = arith.constant 0 : index
    %55 = vector.load %arg4[%c0_26, %c0_27] : memref<2x4xf32, #tpu.memory_space<vmem>>, vector<2x4xf32>
    tpu.vector_store %arg4[%c0_26, %c0_27], %54 {strides = array<i32>} : memref<2x4xf32, #tpu.memory_space<vmem>>, vector<2x4xf32>,
    return
  }
}

</mosaic_0001>

<bundles_post_ra>
// kernel: _forward_jit.1
= control target key start
LH: loop header
LB: loop body
LE: loop exit
PB: predicated region body
PF: predicated region fallthrough
CT: control target
= control target key end

     0   :  { %v18_v0 = vlaneseq  ;;  %v857_v1 = vmov 0.0   ;;  %v858_v7 = vmov 0.0|0.0   ;;  %vm197_vm0 = vcmask 326656   ;;  %s1185_s0 = inlined_call_operand.vmem [shape: s32[2,16], index: 0, kind: input, shape index: {}]   ;;  %s1186_s1 = inlined_call_operand.vmem [shape: f32[2,168], index: 1, kind: input, shape index: {}]   ;;  %s1187_s2 = inlined_call_operand.vmem [shape: f32[344,128], index: 2, kind: input, shape index: {}]   ;;  %s1188_s3 = inlined_call_operand.vmem [shape: f32[216,32], index: 3, kind: input, shape index: {}]   ;;  %s1189_s4 = inlined_call_operand.hbm [shape: f32[2,4], index: 4, kind: output, shape index: {}]  }
   0x1   :  { %126 = vmatprep.mubr.f32.mxu0 %v857_v1  ;;  %v166_v2 = vld [vmem:[%s1187_s2 + $0xb0] sm:$0xff]  ;;  %v167_v3 = vld [vmem:[%s1187_s2 + $0xb8] sm:$0xff]  ;;  %v168_v4 = vld [vmem:[%s1187_s2 + $0xc0] sm:$0xff]  ;;  %726 = vmatprep.subr.bf16.mxu1 %v858_v7 }
   0x2   :  { %v19_v5 = vshrl.u32 %v18_v0, 7  ;;  %v24_v6 = vand.u32 127, %v18_v0  ;;  %v727_v8 = vpack.c.bf16 %v167_v3, %v166_v2  ;;  %v169_v9 = vld [vmem:[%s1187_s2 + $0xc8] sm:$0xff]  ;;  %v170_v13 = vld [vmem:[%s1187_s2 + $0xd0] sm:$0xff]  ;;  %v171_v14 = vld [vmem:[%s1187_s2 + $0xd8] sm:$0xff] }
   0x3   :  { %v730_v12 = vpack.c.bf16 %v169_v9, %v168_v4  ;;  %v733_v20 = vpack.c.bf16 %v171_v14, %v170_v13  ;;  %v917_v21 = vld.sshfl [vmem:[%s1186_s1] sm:$0x33 pattern:$0x76325410]  ;;  %v173_v23 = vld [vmem:[%s1187_s2 + $0xe8] sm:$0xff]  ;;  %v174_v32 = vld [vmem:[%s1187_s2 + $0xf0] sm:$0xff] }
   0x4   :  { %v25_v10 = vadd.s32 128, %v24_v6  ;;  %v26_v11 = vcvt.s32.f32 %v24_v6  ;;  %728 = vmatpush1.bf16.msra.mxu1 %v727_v8  ;;  %v20_v15 = vadd.s32 8, %v19_v5  ;;  %v172_v22 = vld [vmem:[%s1187_s2 + $0xe0] sm:$0xff]  ;;  %v195_v24 = vcombine.high %v917_v21, %v917_v21  ;;  %v175_v33 = vld [vmem:[%s1187_s2 + $0xf8] sm:$0xff] }
   0x5   :  { %729 = vmatprep.subr.bf16.mxu1 %v858_v7  ;;  %v21_v25 = vcvt.s32.f32 %v19_v5  ;;  %v736_v31 = vpack.c.bf16 %v173_v23, %v172_v22 }
   0x6   :  { %v27_v16 = vcvt.s32.f32 %v25_v10  ;;  %v909_v17 = vmul.f32 0.0625, %v26_v11  ;;  %v22_v26 = vcvt.s32.f32 %v20_v15  ;;  %630 = vmatprep.mubr.msk.f32.mxu1 %vm197_vm0, %v195_v24 }
   0x8   :  { %v911_v18 = vmul.f32 0.0625, %v27_v16  ;;  %v30_v19 = vfloor.f32 %v909_v17  ;;  %731 = vmatpush1.bf16.msra.mxu1 %v730_v12 }
   0x9   :  { %732 = vmatprep.subr.bf16.mxu1 %v858_v7 }
   0xa   :  { %v31_v27 = vfloor.f32 %v911_v18  ;;  %v32_v28 = vmul.f32 16.0, %v30_v19 }
   0xc   :  { %v33_v29 = vmul.f32 16.0, %v31_v27  ;;  %v34_v30 = vsub.f32 %v26_v11, %v32_v28  ;;  %734 = vmatpush1.bf16.msra.mxu1 %v733_v20 }
   0xd   :  { %735 = vmatprep.subr.bf16.mxu1 %v858_v7 }
   0xe   :  { %v35_v34 = vsub.f32 %v27_v16, %v33_v29  ;;  %v36_v35 = vsub.f32 %v34_v30, %v21_v25  ;;  %v38_v36 = vsub.f32 %v34_v30, %v22_v26 }
   0xf   :  { %9 = vsyncpa [#allocation3], 0  ;;  %v739_v37 = vpack.c.bf16 %v175_v33, %v174_v32  ;;  %v176_v42 = vld [vmem:[%s1187_s2 + $0x100] sm:$0xff]  ;;  %v177_v43 = vld [vmem:[%s1187_s2 + $0x108] sm:$0xff]  ;;  %v859_v51 = vmov 1.0|1.0  }
  0x10   :  { %v37_v38 = vsub.f32 %v35_v34, %v21_v25  ;;  %v39_v39 = vsub.f32 %v35_v34, %v22_v26  ;;  %v40_v40 = vand.u32 2147483647, %v36_v35  ;;  %v42_v41 = vand.u32 2147483647, %v38_v36  ;;  %737 = vmatpush1.bf16.msra.mxu1 %v736_v31  ;;  %v56_v47 = vld [vmem:[%s1185_s0] sm:$0x3] }
  0x11   :  { %738 = vmatprep.subr.bf16.mxu1 %v858_v7  ;;  %v742_v48 = vpack.c.bf16 %v177_v43, %v176_v42  ;;  %v178_v49 = vld [vmem:[%s1187_s2 + $0x110] sm:$0xff]  ;;  %v179_v50 = vld [vmem:[%s1187_s2 + $0x118] sm:$0xff]  ;;  %v57_v52 = vcvt.s32.f32 %v56_v47  ;;  %vm58_vm7 = vcmask 130048   ;;  %v180_v54 = vld [vmem:[%s1187_s2 + $0x120] sm:$0xff]  ;;  %vm270_vm8 = vcmask 392192   ;;  %s862_s18 = smov [#allocation2]  }
  0x12   :  { %v41_v44 = vand.u32 2147483647, %v37_v38  ;;  %v43_v45 = vand.u32 2147483647, %v39_v39  ;;  %vm947_vm1 = vcmp.lt.f32.partialorder %v40_v40, 0.5  ;;  %vm46_vm2 = vcmp.lt.f32.partialorder %v42_v41, 0.5 }
  0x13   :  { %vm724_vm5 = vmpackc.low %vm46_vm2, %vm947_vm1  ;;  %v745_v53 = vpack.c.bf16 %v179_v50, %v178_v49  ;;  %v181_v55 = vld [vmem:[%s1187_s2 + $0x128] sm:$0xff]  ;;  %v182_v57 = vld [vmem:[%s1187_s2 + $0x130] sm:$0xff]  ;;  %vm861_vm11 = vmmov 0   ;;  %vm445_vm12 = vcmask 261120   ;;  %s610_s19 = sshll.u32 %s862_s18, 4  ;;  %vm602_vm13 = vcmask 25600   ;;  %s611_s19 = int_to_ptr.vmem [resolvable:$true] %s610_s19 }
  0x14   :  { %vm45_vm3 = vcmp.lt.f32.partialorder %v41_v44, 0.5  ;;  %vm47_vm4 = vcmp.lt.f32.partialorder %v43_v45, 0.5  ;;  %740 = vmatpush1.bf16.msra.mxu1 %v739_v37  ;;  %v748_v56 = vpack.c.bf16 %v181_v55, %v180_v54  ;;  %v183_v58 = vld [vmem:[%s1187_s2 + $0x138] sm:$0xff]  ;;  %v184_v60 = vld [vmem:[%s1187_s2 + $0x140] sm:$0xff]  ;;  %v185_v61 = vld [vmem:[%s1187_s2 + $0x148] sm:$0xff]  ;;  %s833_s0 = scalar_lea.vmem %s611_s19, 32  ;;  %p838_p1 = scmp.lt.s32.totalorder %s611_s19, %s611_s19 }
  0x15   :  { %vm722_vm6 = vmpackc.low %vm47_vm4, %vm45_vm3  ;;  %741 = vmatprep.subr.bf16.mxu1 %v858_v7  ;;  %v751_v59 = vpack.c.bf16 %v183_v58, %v182_v57  ;;  %v754_v62 = vpack.c.bf16 %v185_v61, %v184_v60  ;;  %v143_v63 = vld [vmem:[%s1187_s2] sm:$0xff]  ;;  %v144_v0 = vld [vmem:[%s1187_s2 + $0x8] sm:$0xff]  ;;  %p834_p0 = scmp.ne.s32.totalorder %s611_s19, %s833_s0  ;;  %p839_p2 = scmp.lt.s32.totalorder %s833_s0, %s833_s0 }
  0x16   :  { %723 = vmatprep.subr.msk.bf16.mxu0 %vm722_vm6, %v859_v51  ;;  %v186_v2 = vld [vmem:[%s1187_s2 + $0x150] sm:$0xff]  ;;  %v757_v3 = vpack.c.bf16 %v144_v0, %v143_v63  ;;  %v146_v5 = vld [vmem:[%s1187_s2 + $0x18] sm:$0xff]  ;;  %v147_v8 = vld [vmem:[%s1187_s2 + $0x20] sm:$0xff] }
  0x17   :  { %725 = vmatpush1.bf16.msk.msra.mxu0 %vm724_vm5, %v859_v51  ;;  %v145_v4 = vld [vmem:[%s1187_s2 + $0x10] sm:$0xff]  ;;  %v148_v9 = vld [vmem:[%s1187_s2 + $0x28] sm:$0xff]  ;;  %v150_v12 = vld [vmem:[%s1187_s2 + $0x38] sm:$0xff]  ;;  %p840_p3 = por %p839_p2, %p838_p1 }
  0x18   :  { %743 = vmatpush1.bf16.msra.mxu1 %v742_v48  ;;  %789 = vmatprep.subr.bf16.mxu0 %v858_v7  ;;  %v760_v6 = vpack.c.bf16 %v146_v5, %v145_v4  ;;  %v763_v10 = vpack.c.bf16 %v148_v9, %v147_v8  ;;  %v149_v11 = vld [vmem:[%s1187_s2 + $0x30] sm:$0xff]  ;;  %v151_v14 = vld [vmem:[%s1187_s2 + $0x40] sm:$0xff]  ;;  %v152_v15 = vld [vmem:[%s1187_s2 + $0x48] sm:$0xff]  ;;  %v860_v8 = vmov 1.0  }
  0x19   :  { %744 = vmatprep.subr.bf16.mxu1 %v858_v7  ;;  %v766_v13 = vpack.c.bf16 %v150_v12, %v149_v11  ;;  %v769_v16 = vpack.c.bf16 %v152_v15, %v151_v14  ;;  %v153_v20 = vld [vmem:[%s1187_s2 + $0x50] sm:$0xff]  ;;  %v155_v23 = vld [vmem:[%s1187_s2 + $0x60] sm:$0xff]  ;;  %v156_v24 = vld [vmem:[%s1187_s2 + $0x68] sm:$0xff]  ;;  %p841_p4 = pnand %p840_p3, %p834_p0 }
  0x1a   :  { %626 = vmatmul.mubr.msk.f32.vlgmr.msra.gmra.mrb[0].mxu0 %vm58_vm7, %v57_v52  ;;  %v775_v25 = vpack.c.bf16 %v156_v24, %v155_v23  ;;  %v157_v26 = vld [vmem:[%s1187_s2 + $0x70] sm:$0xff]  ;;  %v158_v28 = vld [vmem:[%s1187_s2 + $0x78] sm:$0xff]  ;;  %v159_v30 = vld [vmem:[%s1187_s2 + $0x80] sm:$0xff] }
  0x1b   :  { %v778_v29 = vpack.c.bf16 %v158_v28, %v157_v26  ;;  %v160_v31 = vld [vmem:[%s1187_s2 + $0x88] sm:$0xff]  ;;  %v161_v33 = vld [vmem:[%s1187_s2 + $0x90] sm:$0xff]  ;;  %v162_v34 = vld [vmem:[%s1187_s2 + $0x98] sm:$0xff]  ;;  %697 = vmatprep.mubr.msk.f32.mxu0 %vm861_vm11, %v857_v1 }
  0x1c   :  { %746 = vmatpush1.bf16.msra.mxu1 %v745_v53  ;;  %v781_v32 = vpack.c.bf16 %v160_v31, %v159_v30  ;;  %v784_v35 = vpack.c.bf16 %v162_v34, %v161_v33  ;;  %v163_v36 = vld [vmem:[%s1187_s2 + $0xa0] sm:$0xff]  ;;  %v164_v37 = vld [vmem:[%s1187_s2 + $0xa8] sm:$0xff]  ;;  %v346_v41 = vld [vmem:[%s1188_s3 + $0x10] sm:$0xff] }
  0x1d   :  { %747 = vmatprep.subr.bf16.mxu1 %v858_v7  ;;  %v787_v38 = vpack.c.bf16 %v164_v37, %v163_v36  ;;  %v344_v39 = vld [vmem:[%s1188_s3] sm:$0xff]  ;;  %v345_v40 = vld [vmem:[%s1188_s3 + $0x8] sm:$0xff]  ;;  %v347_v43 = vld [vmem:[%s1188_s3 + $0x18] sm:$0xff] }
  0x1e   :  { %v790_v42 = vpack.c.bf16 %v345_v40, %v344_v39  ;;  %v793_v44 = vpack.c.bf16 %v347_v43, %v346_v41  ;;  %v348_v45 = vld [vmem:[%s1188_s3 + $0x20] sm:$0xff]  ;;  %v349_v46 = vld [vmem:[%s1188_s3 + $0x28] sm:$0xff]  ;;  %v350_v48 = vld [vmem:[%s1188_s3 + $0x30] sm:$0xff] }
  0x1f   :  { %v796_v47 = vpack.c.bf16 %v349_v46, %v348_v45  ;;  %v351_v49 = vld [vmem:[%s1188_s3 + $0x38] sm:$0xff]  ;;  %v352_v51 = vld [vmem:[%s1188_s3 + $0x40] sm:$0xff]  ;;  %v353_v52 = vld [vmem:[%s1188_s3 + $0x48] sm:$0xff] }
  0x20   :  { %749 = vmatpush1.bf16.msra.mxu1 %v748_v56  ;;  %791 = vmatpush3.bf16.msra.mxu0 %v790_v42  ;;  %v799_v50 = vpack.c.bf16 %v351_v49, %v350_v48  ;;  %v802_v53 = vpack.c.bf16 %v353_v52, %v352_v51  ;;  %v354_v54 = vld [vmem:[%s1188_s3 + $0x50] sm:$0xff]  ;;  %v355_v55 = vld [vmem:[%s1188_s3 + $0x58] sm:$0xff]  ;;  %v356_v57 = vld [vmem:[%s1188_s3 + $0x60] sm:$0xff] }
  0x21   :  { %750 = vmatprep.subr.bf16.mxu1 %v858_v7  ;;  %792 = vmatprep.subr.bf16.mxu0 %v858_v7  ;;  %v805_v56 = vpack.c.bf16 %v355_v55, %v354_v54  ;;  %v357_v58 = vld [vmem:[%s1188_s3 + $0x68] sm:$0xff]  ;;  %v358_v60 = vld [vmem:[%s1188_s3 + $0x70] sm:$0xff]  ;;  %v359_v61 = vld [vmem:[%s1188_s3 + $0x78] sm:$0xff] }
  0x22   :  { %v436_v17 = vld [vmem:[%s1188_s3 + $0x88] sm:$0xff]  ;;  %v437_v18 = vld [vmem:[%s1188_s3 + $0x90] sm:$0xff]  ;;  %v439_v11 = vld [vmem:[%s1188_s3 + $0xa0] sm:$0xff] }
  0x23   :  { %v520_v14 = vld [vmem:[%s1188_s3 + $0xb0] sm:$0xff]  ;;  %v521_v15 = vld [vmem:[%s1188_s3 + $0xb8] sm:$0xff]  ;;  %v522_v24 = vld [vmem:[%s1188_s3 + $0xc0] sm:$0xff] }
  0x24   :  { %752 = vmatpush1.bf16.msra.mxu1 %v751_v59  ;;  %794 = vmatpush3.bf16.msra.mxu0 %v793_v44  ;;  %v808_v59 = vpack.c.bf16 %v357_v58, %v356_v57  ;;  %v634_v28 = vld [vmem:[%s1188_s3 + $0xa8] ss:$0 sm:$0xff] }
  0x25   :  { %753 = vmatprep.subr.bf16.mxu1 %v858_v7  ;;  %795 = vmatprep.subr.bf16.mxu0 %v858_v7 }
  0x28   :  { %755 = vmatpush1.bf16.msra.mxu1 %v754_v62  ;;  %797 = vmatpush3.bf16.msra.mxu0 %v796_v47  ;;  %v811_v62 = vpack.c.bf16 %v359_v61, %v358_v60 }
  0x29   :  { %240 = vmatprep.subr.mxu1 %v857_v1  ;;  %798 = vmatprep.subr.bf16.mxu0 %v858_v7 }
  0x2c   :  { %241 = vmatpush1.msra.mxu1 %v186_v2  ;;  %800 = vmatpush3.bf16.msra.mxu0 %v799_v50 }
  0x2d   :  { %756 = vmatprep.subr.bf16.mxu1 %v858_v7  ;;  %265 = vmatmul.mubr.f32.vlgmr.msra.gmra.mrb[0].mxu1 %v917_v21  ;;  %v154_v21 = vld [vmem:[%s1187_s2 + $0x58] sm:$0xff] }
  0x2e   :  { %758 = vmatpush1.bf16.msra.mxu1 %v757_v3  ;;  %v772_v22 = vpack.c.bf16 %v154_v21, %v153_v20  ;;  %801 = vmatprep.subr.bf16.mxu0 %v858_v7 }
  0x2f   :  { %759 = vmatprep.subr.bf16.mxu1 %v858_v7 }
  0x30   :  { %803 = vmatpush3.bf16.msra.mxu0 %v802_v53 }
  0x31   :  { %804 = vmatprep.subr.bf16.mxu0 %v858_v7 }
  0x32   :  { %761 = vmatpush1.bf16.msra.mxu1 %v760_v6 }
  0x33   :  { %762 = vmatprep.subr.bf16.mxu1 %v858_v7 }
  0x34   :  { %806 = vmatpush3.bf16.msra.mxu0 %v805_v56 }
  0x35   :  { %807 = vmatprep.subr.bf16.mxu0 %v858_v7 }
  0x36   :  { %764 = vmatpush1.bf16.msra.mxu1 %v763_v10  ;;  %v438_v10 = vld [vmem:[%s1188_s3 + $0x98] sm:$0xff] }
  0x37   :  { %765 = vmatprep.subr.bf16.mxu1 %v858_v7  ;;  %v817_v12 = vpack.c.bf16 %v439_v11, %v438_v10 }
  0x38   :  { %809 = vmatpush3.bf16.msra.mxu0 %v808_v59 }
  0x39   :  { %810 = vmatprep.subr.bf16.mxu0 %v858_v7 }
  0x3a   :  { %767 = vmatpush1.bf16.msra.mxu1 %v766_v13  ;;  %v633_v13 = vld [vmem:[%s1188_s3 + $0x80] ss:$0 sm:$0xff] }
  0x3b   :  { %768 = vmatprep.subr.bf16.mxu1 %v858_v7 }
  0x3c   :  { %812 = vmatpush3.bf16.msra.mxu0 %v811_v62 }
  0x3d   :  { %813 = vmatprep.subr.bf16.mxu0 %v858_v7 }
  0x3e   :  { %770 = vmatpush1.bf16.msra.mxu1 %v769_v16 }
  0x3f   :  { %771 = vmatprep.subr.bf16.mxu1 %v858_v7 }
  0x42   :  { %773 = vmatpush1.bf16.msra.mxu1 %v772_v22  ;;  %v820_v22 = vpack.c.bf16 %v521_v15, %v520_v14 }
  0x43   :  { %774 = vmatprep.subr.bf16.mxu1 %v858_v7 }
  0x46   :  { %776 = vmatpush1.bf16.msra.mxu1 %v775_v25  ;;  %v523_v25 = vld [vmem:[%s1188_s3 + $0xc8] sm:$0xff] }
  0x47   :  { %777 = vmatprep.subr.bf16.mxu1 %v858_v7  ;;  %v823_v26 = vpack.c.bf16 %v523_v25, %v522_v24 }
  0x4a   :  { %779 = vmatpush1.bf16.msra.mxu1 %v778_v29 }
  0x4b   :  { %780 = vmatprep.subr.bf16.mxu1 %v858_v7 }
  0x4e   :  { %782 = vmatpush1.bf16.msra.mxu1 %v781_v32 }
  0x4f   :  { %783 = vmatprep.subr.bf16.mxu1 %v858_v7 }
  0x52   :  { %785 = vmatpush1.bf16.msra.mxu1 %v784_v35 }
  0x53   :  { %786 = vmatprep.subr.bf16.mxu1 %v858_v7 }
  0x56   :  { %788 = vmatpush1.bf16.msra.mxu1 %v787_v38 }
  0xed   :  { %v128_v63 = vpop.f32.mrb[0].mxu0 }
  0xee   :  { %v133_v0 = vsub.f32 %v128_v63, %v30_v19  ;;  %v130_v2 = vpop.f32.mrb[1].mxu0  ;;  %v814_v19 = vpack.c.bf16 %v437_v18, %v436_v17 }
  0xef   :  { %v134_v3 = vsub.f32 %v130_v2, %v31_v27 }
  0xf0   :  { %v135_v4 = vand.u32 2147483647, %v133_v0 }
  0xf1   :  { %v136_v5 = vand.u32 2147483647, %v134_v3 }
  0xf2   :  { %vm137_vm10 = vcmp.lt.f32.partialorder %v135_v4, 0.5 }
  0xf3   :  { %vm138_vm9 = vcmp.lt.f32.partialorder %v136_v5, 0.5 }
  0xf4   :  { %v628_v6 = vsel %vm138_vm9, 1.0, %v857_v1 }
  0xf5   :  { %631 = vmatprep.mubr.msk.f32.mxu1 %vm270_vm8, %v628_v6 }
  0xf6   :  { %632 = vmatmul.mubr.msk.f32.vlgmr.msra.gmra.mrb[0].mxu1 %vm137_vm10, %v860_v8 }
 0x1c9   :  { %v340_v27 = vpop.f32.mrb[0].mxu1 }
 0x1ca   :  { %v342_v9 = vpop.f32.mrb[1].mxu1  ;;  %698 = vmatmul.mubr.f32.vlgmr.msra.gmra.mrb[2].mxu0 %v340_v27 }
 0x1cb   :  { %815 = vmatpush3.bf16.msra.mxu0 %v814_v19  ;;  %708 = vmatprep.mubr.msk.f32.mxu0 %vm861_vm11, %v857_v1 }
 0x1cc   :  { %816 = vmatprep.subr.bf16.mxu0 %v858_v7 }
 0x1cf   :  { %818 = vmatpush3.bf16.msra.mxu0 %v817_v12 }
 0x1d0   :  { %819 = vmatprep.subr.bf16.mxu0 %v858_v7 }
 0x29d   :  { %v431_v16 = vpop.f32.mrb[2].mxu0 }
 0x29e   :  { %v432_v20 = vadd.f32 %v633_v13, %v431_v16  ;;  %v699_v21 = vpop.f32.mrb[3].mxu0 }
 0x2a0   :  { %v435_v23 = vmax.f32 %v432_v20, 0.0 }
 0x2a2   :  { %709 = vmatmul.mubr.msk.f32.vlgmr.msra.gmra.mrb[4].mxu0 %vm445_vm12, %v435_v23 }
 0x2a3   :  { %821 = vmatpush3.bf16.msra.mxu0 %v820_v22  ;;  %719 = vmatprep.mubr.msk.f32.mxu0 %vm861_vm11, %v857_v1 }
 0x2a4   :  { %822 = vmatprep.subr.bf16.mxu0 %v858_v7  ;;  %v636_v7 = vld [vmem:[%s1188_s3 + $0xd0] ss:$0 sm:$0xff] }
 0x2a7   :  { %824 = vmatpush3.bf16.msra.mxu0 %v823_v26 }
 0x375   :  { %v515_v29 = vpop.f32.mrb[4].mxu0 }
 0x376   :  { %v516_v30 = vadd.f32 %v634_v28, %v515_v29  ;;  %v710_v31 = vpop.f32.mrb[5].mxu0 }
 0x378   :  { %v519_v1 = vmax.f32 %v516_v30, 0.0 }
 0x37a   :  { %720 = vmatmul.mubr.msk.f32.vlgmr.msra.gmra.mrb[6].mxu0 %vm445_vm12, %v519_v1 }
 0x44d   :  { %v598_v32 = vpop.f32.mrb[6].mxu0 }
 0x44e   :  { %v599_v33 = vadd.f32 %v636_v7, %v598_v32  ;;  %v721_v34 = vpop.f32.mrb[7].mxu0 }
 0x450   :  { %603 = vst.msk [vmem:[#allocation2] sm:$0x3] %vm602_vm13, %v599_v33 }
 0x451   :  { %844 = shalt.err (!%p841_p4)
}
 0x452   :  { %s845_s22 = scalar_lea.hbm %s1189_s4, 32 }
 0x453   :  { %p846_p5 = scmp.ne.s32.totalorder %s1189_s4, %s845_s22  ;;  %p849_p6 = scmp.lt.u32.totalorder %s845_s22, %s1189_s4 }
 0x455   :  { %p851_p7 = pnand %p849_p6, %p846_p5 }
 0x457   :  { %854 = shalt.err (!%p851_p7)
}
 0x458   :  { %613 = dma.vmem_to_hbm [thread:$0]  %s611_s19, 32, %s1189_s4, [#allocation3]  }
 0x459   :  { %855 = dma.done.wait [#allocation3], 32  }
 0x45a   :  { %856 = vsyncadd [#allocation3], 4294967264 }
 0x45b   :  { %617 = vsyncpa [#allocation3], 1 }

</bundles_post_ra>
